<compile_context>
chip_gen: v7x
topology: tpu7x:2x2x1
jax: 0.10.0
libtpu: 0.0.40
codegen_flags: <defaults>
</compile_context>

<pallas_src>
import functools

import jax
import jax.numpy as jnp
import numpy as np
from jax import lax
from jax.experimental import pallas as pl
from jax.experimental.pallas import tpu as pltpu


def _xcorr_fused_kernel(zbd_ref, patches_ref, o_ref, *, out_scale):
    # zbd_ref:     (bt, bt*K)    block-diagonal flattened templates
    # patches_ref: (bt*K, P_pad) stacked im2col patches (ragged tail = unspecified)
    # o_ref:       (bt, P_pad)
    # One MXU matmul for the whole batch tile, f32 accumulation, then one
    # unmasked lane-dense store of the full block.
    acc = jnp.dot(zbd_ref[...], patches_ref[...],
                  preferred_element_type=jnp.float32)        # (bt, P_pad)
    o_ref[...] = (acc * out_scale).astype(o_ref.dtype)


def _has_two_tensorcores():
    # v7x packs 2 TensorCores per chip; v5e/v6e have 1. Best-effort detection;
    # default to the v5e/v6e-friendly single-step grid if unknown.
    try:
        kind = jax.devices()[0].device_kind.lower()
    except Exception:
        return False
    return "v7" in kind or "7x" in kind


def _pick_batch_tile(nx):
    """Batch elements per grid step. Capped at 8 so the per-step tile stays
    small (no spills, no huge unroll); on 2-TC chips tiny batches still get a
    >= 2-step 'parallel' grid so both TensorCores have work."""
    if nx > 8:
        return 8
    if nx >= 2 and _has_two_tensorcores():
        return (nx + 1) // 2
    return max(nx, 1)


def cross_correlation(x, z, out_scale=0.001):
    """Pallas equivalent of CrossCorrelation.forward(x, z)."""
    nx, c, h, w = x.shape
    nz, cz, hz, wz = z.shape
    assert nx == nz and c == cz, "batch / channel mismatch (module assumes nx == nz)"
    assert hz <= h and wz <= w, "template must not be larger than the search map"

    ho, wo = h - hz + 1, w - wz + 1
    k = c * hz * wz
    p = ho * wo
    p_pad = pl.cdiv(p, 128) * 128

    bt = _pick_batch_tile(nx)
    n_tiles = pl.cdiv(nx, bt)
    nx_pad = n_tiles * bt
    if nx_pad != nx:
        padn = nx_pad - nx
        x = jnp.pad(x, ((0, padn), (0, 0), (0, 0), (0, 0)))
        z = jnp.pad(z, ((0, padn), (0, 0), (0, 0), (0, 0)))

    # im2col in the wrapper (layout plumbing only). Feature order is
    # (c, di, dj) row-major, matching z.reshape(nz, c*hz*wz).
    # NOTE: no jnp.pad of the spatial dim — the Pallas block handles the
    # ragged tail.
    patches = lax.conv_general_dilated_patches(
        x, (hz, wz), (1, 1), "VALID",
        dimension_numbers=("NCHW", "OIHW", "NCHW"))           # (nx_pad, K, ho, wo)
    patches = patches.reshape(n_tiles, bt * k, p)             # tile-stacked RHS

    # Block-diagonal template LHS so each batch tile is ONE dense MXU matmul:
    #   z_bd[t, a, b*K + kk] = z[t*bt + b, kk] if a == b else 0
    z_flat = z.reshape(n_tiles, bt, k)
    eye = jnp.eye(bt, dtype=z.dtype)
    z_bd = (eye[None, :, :, None] * z_flat[:, None, :, :]).reshape(n_tiles, bt, bt * k)

    itemsize = x.dtype.itemsize
    cost = pl.CostEstimate(
        flops=2 * nx * k * p,
        transcendentals=0,
        bytes_accessed=(patches.size + z_bd.size + nx_pad * p_pad) * itemsize,
    )

    kernel = functools.partial(_xcorr_fused_kernel, out_scale=out_scale)
    out_flat = pl.pallas_call(
        kernel,
        out_shape=jax.ShapeDtypeStruct((n_tiles, bt, p_pad), x.dtype),
        grid=(n_tiles,),
        in_specs=[
            pl.BlockSpec((None, bt, bt * k), lambda g: (g, 0, 0)),
            pl.BlockSpec((None, bt * k, p_pad), lambda g: (g, 0, 0)),
        ],
        out_specs=pl.BlockSpec((None, bt, p_pad), lambda g: (g, 0, 0)),
        compiler_params=pltpu.CompilerParams(
            dimension_semantics=("parallel",),
            allow_input_fusion=[True, True],
        ),
        cost_estimate=cost,
    )(z_bd, patches)

    out_flat = out_flat.reshape(nx_pad, p_pad)
    return out_flat[:nx, :p].reshape(nx, 1, ho, wo)


def _reference(x, z, out_scale=0.001):
    """Pure-JAX reference mirroring the PyTorch grouped-conv formulation."""
    nx, c, h, w = x.shape
    nz = z.shape[0]
    x_r = x.reshape(1, nz * c, h, w)
    out = lax.conv_general_dilated(
        x_r.astype(jnp.float32),
        z.astype(jnp.float32),
        window_strides=(1, 1),
        padding="VALID",
        dimension_numbers=("NCHW", "OIHW", "NCHW"),
        feature_group_count=nz,
    )
    return (out.reshape(nx, -1, out.shape[-2], out.shape[-1]) * out_scale).astype(x.dtype)


if __name__ == "__main__":
    key = jax.random.PRNGKey(0)
    kx, kz = jax.random.split(key)

    # Small shapes consistent with the module: search maps (2, 4, 16, 16),
    # per-batch templates (2, 4, 8, 8) -> output (2, 1, 9, 9).
    x = jax.random.normal(kx, (2, 4, 16, 16), dtype=jnp.float32)
    z = jax.random.normal(kz, (2, 4, 8, 8), dtype=jnp.float32)

    out = jax.block_until_ready(cross_correlation(x, z, out_scale=0.001))
    ref = jax.block_until_ready(_reference(x, z, out_scale=0.001))
    np.testing.assert_allclose(np.asarray(out), np.asarray(ref), rtol=1e-4, atol=1e-6)

    print("KERNEL_OK")
</pallas_src>

<mosaic_0001>
module attributes {stable_mosaic.version = 11 : i64} {
  func.func @_xcorr_fused_kernel(%arg0: i32, %arg1: memref<1x2x512xf32, #tpu.memory_space<vmem>>, %arg2: memref<1x512x128xf32, #tpu.memory_space<vmem>>, %arg3: memref<1x2x128xf32, #tpu.memory_space<vmem>>) attributes {dimension_semantics = [#tpu.dimension_semantics<parallel>], iteration_bounds = array<i64: 1>, scalar_prefetch = 0 : i64, scratch_operands = 0 : i64, tpu.core_type = #tpu.core_type<tc>, window_params = [{transform_indices = @transform_0, window_bounds = array<i64: 1, 2, 512>}, {transform_indices = @transform_1, window_bounds = array<i64: 1, 512, 128>}, {transform_indices = @transform_2, window_bounds = array<i64: 1, 2, 128>}]} {
    %c0 = arith.constant 0 : index
    %c0_0 = arith.constant 0 : index
    %c0_1 = arith.constant 0 : index
    %0 = vector.load %arg1[%c0, %c0_0, %c0_1] : memref<1x2x512xf32, #tpu.memory_space<vmem>>, vector<1x2x512xf32>
    %1 = vector.shape_cast %0 : vector<1x2x512xf32> to vector<2x512xf32>
    %c0_2 = arith.constant 0 : index
    %c0_3 = arith.constant 0 : index
    %c0_4 = arith.constant 0 : index
    %2 = vector.load %arg2[%c0_2, %c0_3, %c0_4] : memref<1x512x128xf32, #tpu.memory_space<vmem>>, vector<1x512x128xf32>
    %3 = vector.shape_cast %2 : vector<1x512x128xf32> to vector<512x128xf32>
    %cst = arith.constant dense<0.000000e+00> : vector<2x128xf32>
    %4 = tpu.matmul %1, %3, %cst {dimension_numbers = #tpu.dot_dimension_numbers<[1], [0], [0], [1], [0, 0, 1, 1], [], []>} : vector<2x512xf32>, vector<512x128xf32>, vector<2x128xf32> -> vector<2x128xf32>
    %cst_5 = arith.constant 1.000000e-03 : f32
    %5 = vector.broadcast %cst_5 : f32 to vector<2x128xf32>
    %6 = arith.mulf %4, %5 : vector<2x128xf32>
    %c0_6 = arith.constant 0 : index
    %c0_7 = arith.constant 0 : index
    %c0_8 = arith.constant 0 : index
    %7 = vector.load %arg3[%c0_6, %c0_7, %c0_8] : memref<1x2x128xf32, #tpu.memory_space<vmem>>, vector<1x2x128xf32>
    %8 = vector.shape_cast %7 : vector<1x2x128xf32> to vector<2x128xf32>
    %9 = vector.shape_cast %6 : vector<2x128xf32> to vector<1x2x128xf32>
    tpu.vector_store %arg3[%c0_6, %c0_7, %c0_8], %9 {strides = array<i32>} : memref<1x2x128xf32, #tpu.memory_space<vmem>>, vector<1x2x128xf32>,
    return
  }
  func.func @transform_0(%arg0: i32) -> (i32, i32, i32) {
    %c0_i32 = arith.constant 0 : i32
    %c0_i32_0 = arith.constant 0 : i32
    %c0_i32_1 = arith.constant 0 : i32
    return %arg0, %c0_i32, %c0_i32_0 : i32, i32, i32
  }
  func.func @transform_1(%arg0: i32) -> (i32, i32, i32) {
    %c0_i32 = arith.constant 0 : i32
    %c0_i32_0 = arith.constant 0 : i32
    %c0_i32_1 = arith.constant 0 : i32
    return %arg0, %c0_i32, %c0_i32_0 : i32, i32, i32
  }
  func.func @transform_2(%arg0: i32) -> (i32, i32, i32) {
    %c0_i32 = arith.constant 0 : i32
    %c0_i32_0 = arith.constant 0 : i32
    %c0_i32_1 = arith.constant 0 : i32
    return %arg0, %c0_i32, %c0_i32_0 : i32, i32, i32
  }
}

</mosaic_0001>

<bundles_post_ra>
// kernel: tpu_custom_call.1
= control target key start
LH: loop header
LB: loop body
LE: loop exit
PB: predicated region body
PF: predicated region fallthrough
CT: control target
= control target key end

     0   :  { %v416_v47 = vmov 1983009808   ;;  %v82_v49 = vlaneseq  ;;  %s640_s0 = inlined_call_operand.vmem [shape: f32[1,2,512], index: 0, kind: input, shape index: {}]   ;;  %s641_s1 = inlined_call_operand.vmem [shape: f32[1,512,81], index: 1, kind: input, shape index: {}]   ;;  %s642_s2 = inlined_call_operand.hbm [shape: f32[1,2,128], index: 2, kind: output, shape index: {}]  }
   0x1   :  { %v29_v0 = vld [vmem:[%s641_s1 + $0x80] sm:$0xff]  ;;  %v30_v1 = vld [vmem:[%s641_s1 + $0x88] sm:$0xff]  ;;  %v31_v11 = vld [vmem:[%s641_s1 + $0x90] sm:$0xff]  ;;  %v80_v48 = vunpack.c.l.s4 %v416_v47 }
   0x2   :  { %v61_v2 = vld [vmem:[%s641_s1 + $0x180] sm:$0xff]  ;;  %v325_v3 = vpack.c.bf16 %v30_v1, %v29_v0  ;;  %v62_v4 = vld [vmem:[%s641_s1 + $0x188] sm:$0xff]  ;;  %v32_v13 = vld [vmem:[%s641_s1 + $0x98] sm:$0xff]  ;;  %v83_v0 = vshrl.u32 %v82_v49, 7 }
   0x3   :  { %v13_v5 = vld [vmem:[%s641_s1] sm:$0xff]  ;;  %v14_v6 = vld [vmem:[%s641_s1 + $0x8] sm:$0xff]  ;;  %v357_v7 = vpack.c.bf16 %v62_v4, %v61_v2  ;;  %v63_v14 = vld [vmem:[%s641_s1 + $0x190] sm:$0xff]  ;;  %v329_v16 = vpack.c.bf16 %v32_v13, %v31_v11  ;;  %v81_v63 = vunpack.c.0.s8 %v80_v48 }
   0x4   :  { %v327_v8 = vpack.c.bf16 %v14_v6, %v13_v5  ;;  %v45_v9 = vld [vmem:[%s641_s1 + $0x100] sm:$0xff]  ;;  %v46_v10 = vld [vmem:[%s641_s1 + $0x108] sm:$0xff]  ;;  %326 = vmatprep.subr.bf16.mxu0 %v325_v3  ;;  %v64_v15 = vld [vmem:[%s641_s1 + $0x198] sm:$0xff] }
   0x5   :  { %v359_v12 = vpack.c.bf16 %v46_v10, %v45_v9  ;;  %358 = vmatprep.subr.bf16.mxu1 %v357_v7  ;;  %v361_v17 = vpack.c.bf16 %v64_v15, %v63_v14  ;;  %v15_v18 = vld [vmem:[%s641_s1 + $0x10] sm:$0xff]  ;;  %v16_v19 = vld [vmem:[%s641_s1 + $0x18] sm:$0xff]  ;;  %v33_v23 = vld [vmem:[%s641_s1 + $0xa0] sm:$0xff]  ;;  %v84_v13 = vsub.s32 %v81_v63, %v83_v0 }
   0x6   :  { %328 = vmatpush3.bf16.msra.mxu0 %v327_v8  ;;  %v47_v20 = vld [vmem:[%s641_s1 + $0x110] sm:$0xff]  ;;  %v331_v21 = vpack.c.bf16 %v16_v19, %v15_v18  ;;  %v48_v22 = vld [vmem:[%s641_s1 + $0x118] sm:$0xff]  ;;  %v34_v24 = vld [vmem:[%s641_s1 + $0xa8] sm:$0xff] }
   0x7   :  { %360 = vmatpush3.bf16.msra.mxu1 %v359_v12  ;;  %330 = vmatprep.subr.bf16.mxu0 %v329_v16  ;;  %v363_v25 = vpack.c.bf16 %v48_v22, %v47_v20  ;;  %v333_v26 = vpack.c.bf16 %v34_v24, %v33_v23  ;;  %v65_v27 = vld [vmem:[%s641_s1 + $0x1a0] sm:$0xff]  ;;  %v66_v28 = vld [vmem:[%s641_s1 + $0x1a8] sm:$0xff]  ;;  %v35_v35 = vld [vmem:[%s641_s1 + $0xb0] sm:$0xff] }
   0x8   :  { %362 = vmatprep.subr.bf16.mxu1 %v361_v17  ;;  %v17_v29 = vld [vmem:[%s641_s1 + $0x20] sm:$0xff]  ;;  %v365_v30 = vpack.c.bf16 %v66_v28, %v65_v27  ;;  %v18_v31 = vld [vmem:[%s641_s1 + $0x28] sm:$0xff]  ;;  %v36_v36 = vld [vmem:[%s641_s1 + $0xb8] sm:$0xff] }
   0x9   :  { %v49_v32 = vld [vmem:[%s641_s1 + $0x120] sm:$0xff]  ;;  %v50_v33 = vld [vmem:[%s641_s1 + $0x128] sm:$0xff]  ;;  %v335_v34 = vpack.c.bf16 %v18_v31, %v17_v29  ;;  %v67_v37 = vld [vmem:[%s641_s1 + $0x1b0] sm:$0xff]  ;;  %v337_v39 = vpack.c.bf16 %v36_v36, %v35_v35 }
   0xa   :  { %332 = vmatpush3.bf16.msra.mxu0 %v331_v21  ;;  %v367_v38 = vpack.c.bf16 %v50_v33, %v49_v32  ;;  %v68_v40 = vld [vmem:[%s641_s1 + $0x1b8] sm:$0xff]  ;;  %v19_v41 = vld [vmem:[%s641_s1 + $0x30] sm:$0xff]  ;;  %v37_v46 = vld [vmem:[%s641_s1 + $0xc0] sm:$0xff] }
   0xb   :  { %364 = vmatpush3.bf16.msra.mxu1 %v363_v25  ;;  %334 = vmatprep.subr.bf16.mxu0 %v333_v26  ;;  %v20_v42 = vld [vmem:[%s641_s1 + $0x38] sm:$0xff]  ;;  %v369_v43 = vpack.c.bf16 %v68_v40, %v67_v37  ;;  %v51_v44 = vld [vmem:[%s641_s1 + $0x130] sm:$0xff]  ;;  %v38_v50 = vld [vmem:[%s641_s1 + $0xc8] sm:$0xff] }
   0xc   :  { %366 = vmatprep.subr.bf16.mxu1 %v365_v30  ;;  %v52_v45 = vld [vmem:[%s641_s1 + $0x138] sm:$0xff]  ;;  %v69_v51 = vld [vmem:[%s641_s1 + $0x1c0] sm:$0xff]  ;;  %v70_v52 = vld [vmem:[%s641_s1 + $0x1c8] sm:$0xff]  ;;  %v339_v53 = vpack.c.bf16 %v20_v42, %v19_v41  ;;  %v341_v55 = vpack.c.bf16 %v38_v50, %v37_v46 }
   0xd   :  { %v371_v54 = vpack.c.bf16 %v52_v45, %v51_v44  ;;  %v21_v56 = vld [vmem:[%s641_s1 + $0x40] sm:$0xff]  ;;  %v22_v57 = vld [vmem:[%s641_s1 + $0x48] sm:$0xff]  ;;  %v373_v59 = vpack.c.bf16 %v70_v52, %v69_v51  ;;  %v39_v61 = vld [vmem:[%s641_s1 + $0xd0] sm:$0xff] }
   0xe   :  { %336 = vmatpush3.bf16.msra.mxu0 %v335_v34  ;;  %v53_v58 = vld [vmem:[%s641_s1 + $0x140] sm:$0xff]  ;;  %v54_v60 = vld [vmem:[%s641_s1 + $0x148] sm:$0xff]  ;;  %v40_v62 = vld [vmem:[%s641_s1 + $0xd8] sm:$0xff]  ;;  %v343_v3 = vpack.c.bf16 %v22_v57, %v21_v56 }
   0xf   :  { %368 = vmatpush3.bf16.msra.mxu1 %v367_v38  ;;  %338 = vmatprep.subr.bf16.mxu0 %v337_v39  ;;  %v71_v1 = vld [vmem:[%s641_s1 + $0x1d0] sm:$0xff]  ;;  %v72_v2 = vld [vmem:[%s641_s1 + $0x1d8] sm:$0xff]  ;;  %v375_v4 = vpack.c.bf16 %v54_v60, %v53_v58  ;;  %v345_v5 = vpack.c.bf16 %v40_v62, %v39_v61  ;;  %v41_v11 = vld [vmem:[%s641_s1 + $0xe0] sm:$0xff] }
  0x10   :  { %370 = vmatprep.subr.bf16.mxu1 %v369_v43  ;;  %v23_v6 = vld [vmem:[%s641_s1 + $0x50] sm:$0xff]  ;;  %v24_v7 = vld [vmem:[%s641_s1 + $0x58] sm:$0xff]  ;;  %v377_v9 = vpack.c.bf16 %v72_v2, %v71_v1  ;;  %v42_v12 = vld [vmem:[%s641_s1 + $0xe8] sm:$0xff] }
  0x11   :  { %v55_v8 = vld [vmem:[%s641_s1 + $0x150] sm:$0xff]  ;;  %v56_v10 = vld [vmem:[%s641_s1 + $0x158] sm:$0xff]  ;;  %v73_v14 = vld [vmem:[%s641_s1 + $0x1e0] sm:$0xff]  ;;  %v347_v16 = vpack.c.bf16 %v24_v7, %v23_v6  ;;  %v349_v20 = vpack.c.bf16 %v42_v12, %v41_v11 }
  0x12   :  { %340 = vmatpush3.bf16.msra.mxu0 %v339_v53  ;;  %v74_v15 = vld [vmem:[%s641_s1 + $0x1e8] sm:$0xff]  ;;  %v25_v17 = vld [vmem:[%s641_s1 + $0x60] sm:$0xff]  ;;  %v379_v19 = vpack.c.bf16 %v56_v10, %v55_v8 }
  0x13   :  { %372 = vmatpush3.bf16.msra.mxu1 %v371_v54  ;;  %342 = vmatprep.subr.bf16.mxu0 %v341_v55  ;;  %v26_v18 = vld [vmem:[%s641_s1 + $0x68] sm:$0xff]  ;;  %v57_v21 = vld [vmem:[%s641_s1 + $0x160] sm:$0xff] }
  0x14   :  { %374 = vmatprep.subr.bf16.mxu1 %v373_v59  ;;  %v12_v22 = vld [vmem:[%s640_s0] sm:$0xff] }
  0x16   :  { %344 = vmatpush3.bf16.msra.mxu0 %v343_v3 }
  0x17   :  { %376 = vmatpush3.bf16.msra.mxu1 %v375_v4  ;;  %346 = vmatprep.subr.bf16.mxu0 %v345_v5 }
  0x18   :  { %7 = vsyncpa [#allocation3], 0  ;;  %378 = vmatprep.subr.bf16.mxu1 %v377_v9  ;;  %v381_v23 = vpack.c.bf16 %v74_v15, %v73_v14  ;;  %v58_v24 = vld [vmem:[%s641_s1 + $0x168] sm:$0xff]  ;;  %v43_v25 = vld [vmem:[%s641_s1 + $0xf0] sm:$0xff]  ;;  %v85_v27 = vrot.slane %v12_v22, %v84_v13  ;;  %v78_v28 = vcombine.high %v12_v22, %v12_v22  ;;  %v351_v31 = vpack.c.bf16 %v26_v18, %v25_v17 }
  0x19   :  { %v44_v26 = vld [vmem:[%s641_s1 + $0xf8] sm:$0xff]  ;;  %v75_v29 = vld [vmem:[%s641_s1 + $0x1f0] sm:$0xff]  ;;  %v383_v34 = vpack.c.bf16 %v58_v24, %v57_v21 }
  0x1a   :  { %v76_v30 = vld [vmem:[%s641_s1 + $0x1f8] sm:$0xff]  ;;  %348 = vmatpush3.bf16.msra.mxu0 %v347_v16  ;;  %v93_v32 = vcombine.high %v85_v27, %v85_v27  ;;  %v92_v33 = vrot.slane %v78_v28, %v84_v13  ;;  %v353_v35 = vpack.c.bf16 %v44_v26, %v43_v25  ;;  %v27_v36 = vld [vmem:[%s641_s1 + $0x70] sm:$0xff] }
  0x1b   :  { %380 = vmatpush3.bf16.msra.mxu1 %v379_v19  ;;  %350 = vmatprep.subr.bf16.mxu0 %v349_v20  ;;  %v28_v37 = vld [vmem:[%s641_s1 + $0x78] sm:$0xff]  ;;  %v385_v38 = vpack.c.bf16 %v76_v30, %v75_v29  ;;  %v59_v39 = vld [vmem:[%s641_s1 + $0x170] sm:$0xff] }
  0x1c   :  { %382 = vmatprep.subr.bf16.mxu1 %v381_v23  ;;  %v60_v40 = vld [vmem:[%s641_s1 + $0x178] sm:$0xff]  ;;  %163 = vmatprep.mubr.f32.mxu0 %v93_v32  ;;  %v94_v41 = vcombine.high %v92_v33, %v92_v33  ;;  %v355_v42 = vpack.c.bf16 %v28_v37, %v27_v36  ;;  %s417_s1 = smov [#allocation2]  }
  0x1d   :  { %v387_v43 = vpack.c.bf16 %v60_v40, %v59_v39  ;;  %s247_s26 = sshll.u32 %s417_s1, 4  ;;  %s248_s26 = int_to_ptr.vmem [resolvable:$true] %s247_s26 }
  0x1e   :  { %352 = vmatpush3.bf16.msra.mxu0 %v351_v31  ;;  %233 = vmatprep.mubr.f32.mxu1 %v94_v41  ;;  %s392_s27 = scalar_lea.vmem %s248_s26, 32  ;;  %p397_p1 = scmp.lt.s32.totalorder %s248_s26, %s248_s26 }
  0x1f   :  { %384 = vmatpush3.bf16.msra.mxu1 %v383_v34  ;;  %354 = vmatprep.subr.bf16.mxu0 %v353_v35  ;;  %p393_p0 = scmp.ne.s32.totalorder %s248_s26, %s392_s27  ;;  %p398_p2 = scmp.lt.s32.totalorder %s392_s27, %s392_s27 }
  0x20   :  { %386 = vmatprep.subr.bf16.mxu1 %v385_v38 }
  0x21   :  { %p399_p3 = por %p398_p2, %p397_p1 }
  0x22   :  { %356 = vmatpush3.bf16.msra.mxu0 %v355_v42 }
  0x23   :  { %388 = vmatpush3.bf16.msra.mxu1 %v387_v43  ;;  %p400_p4 = pnand %p399_p3, %p393_p0 }
  0x25   :  { %164 = vmatmul.mubr.f32.vlgmr.msra.gmra.mrb[0].mxu0 %v85_v27 }
  0x26   :  { %234 = vmatmul.mubr.f32.vlgmr.msra.gmra.mrb[0].mxu1 %v92_v33 }
  0xf8   :  { %v287_v44 = vpop.f32.mrb[0].mxu0 }
  0xf9   :  { %v322_v45 = vpop.f32.mrb[0].mxu1  ;;  %v288_v46 = vpop.f32.mrb[1].mxu0 }
  0xfa   :  { %v289_v47 = vadd.f32 %v288_v46, %v287_v44  ;;  %v323_v48 = vpop.f32.mrb[1].mxu1 }
  0xfb   :  { %v324_v49 = vadd.f32 %v323_v48, %v322_v45 }
  0xfd   :  { %v236_v50 = vadd.f32 %v324_v49, %v289_v47 }
  0xff   :  { %v239_v51 = vmul.f32 0.001, %v236_v50 }
 0x101   :  { %240 = vst [vmem:[#allocation2] sm:$0x3] %v239_v51 }
 0x102   :  { %403 = shalt.err (!%p400_p4)
}
 0x103   :  { %s404_s30 = scalar_lea.hbm %s642_s2, 32 }
 0x104   :  { %p405_p5 = scmp.ne.s32.totalorder %s642_s2, %s404_s30  ;;  %p408_p6 = scmp.lt.u32.totalorder %s404_s30, %s642_s2 }
 0x106   :  { %p410_p7 = pnand %p408_p6, %p405_p5 }
 0x108   :  { %413 = shalt.err (!%p410_p7)
}
 0x109   :  { %250 = dma.vmem_to_hbm [thread:$0]  %s248_s26, 32, %s642_s2, [#allocation3]  }
 0x10a   :  { %414 = dma.done.wait [#allocation3], 32  }
 0x10b   :  { %415 = vsyncadd [#allocation3], 4294967264 }
 0x10c   :  { %254 = vsyncpa [#allocation3], 1 }

</bundles_post_ra>
